<compile_context>
chip_gen: v7x
topology: tpu7x:2x2x1
jax: 0.10.0
libtpu: 0.0.40
codegen_flags: <defaults>
</compile_context>

<pallas_src>
import jax
import jax.numpy as jnp
from jax.experimental import pallas as pl
from jax.experimental.pallas import tpu as pltpu

# ----------------------------- hyper-parameters ------------------------------
FFT_CHANNELS = 16   # config.fft_channels  (Decoder output width)
NHID = 32           # hparams.nhid
NLAYERS = 2         # hparams.nlayers
BATCH = 300         # example batch (exercises padding + multi-step grid path)


def _round_up(n, m):
    return ((n + m - 1) // m) * m


def _num_tensorcores():
    """Best-effort TensorCores-per-chip (2 on v7x, else 1). Harmless if wrong."""
    try:
        kind = jax.devices()[0].device_kind.lower()
    except Exception:
        return 1
    return 2 if "v7" in kind else 1


# --------------------------------- kernel ------------------------------------
def decoder_kernel(x_ref, w_in_ref, b_in_ref, w_hid_ref, b_hid_ref,
                   w_out_ref, b_out_ref, out_ref):
    # x_ref:    (1, TB)                f32   (batch on the lane axis)
    # w_in_ref: (NHID, 1)              f32
    # b_in_ref: (NHID, 1)              f32
    # w_hid:    (NLAYERS, NHID, NHID)  bf16  (torch (out, in) layout)
    # b_hid:    (NLAYERS, NHID, 1)     f32
    # w_out:    (FFT, NHID)            bf16
    # b_out:    (FFT, 1)               f32
    # out_ref:  (FFT, TB)              out_dtype

    # input_fc: K=1 contraction -> pure VPU outer product, no MXU pass.
    h = jnp.maximum(w_in_ref[...] * x_ref[...] + b_in_ref[...], 0.0)  # (NHID, TB)
    h = h.astype(jnp.bfloat16)

    # hidden layers (static unroll; NLAYERS is small and compile-time fixed)
    for l in range(NLAYERS):
        acc = jnp.dot(w_hid_ref[l], h, preferred_element_type=jnp.float32)
        h = jnp.maximum(acc + b_hid_ref[l], 0.0).astype(jnp.bfloat16)

    # output_fc + final relu -> lane-dense (FFT, TB) store
    y = jnp.dot(w_out_ref[...], h, preferred_element_type=jnp.float32)
    out_ref[...] = jnp.maximum(y + b_out_ref[...], 0.0).astype(out_ref.dtype)


# -------------------------------- wrapper -------------------------------------
def decoder_forward(x, params, *, block_b=2048, num_cores=None,
                    feature_major_output=False, out_dtype=jnp.float32):
    """x: (B, 1) f32 -> (B, FFT) f32 (or (FFT, B) if feature_major_output)."""
    w_in, b_in, w_hid, b_hid, w_out, b_out = params
    B = x.shape[0]
    if num_cores is None:
        num_cores = _num_tensorcores()

    # --- batch tiling ---------------------------------------------------------
    # Defensive: keep the lane (batch) tile a multiple of 128.
    block_b = max(128, _round_up(block_b, 128))
    b128 = _round_up(B, 128)
    n_steps = pl.cdiv(b128, block_b)
    if num_cores > 1 and b128 >= num_cores * 128:
        # v7x: even split of grid steps across the two TensorCores.
        n_steps = _round_up(n_steps, num_cores)
    TB = _round_up(pl.cdiv(b128, n_steps), 128)
    B_pad = _round_up(B, TB)
    grid = (B_pad // TB,)

    # Transpose + pad batch so it lives on the lane axis inside the kernel.
    xT = jnp.pad(jnp.transpose(x), ((0, 0), (0, B_pad - B)))   # (1, B_pad)

    const2 = lambda i: (0, 0)
    const3 = lambda i: (0, 0, 0)

    yT = pl.pallas_call(
        decoder_kernel,
        out_shape=jax.ShapeDtypeStruct((FFT_CHANNELS, B_pad), out_dtype),
        grid_spec=pltpu.PrefetchScalarGridSpec(
            num_scalar_prefetch=0,
            grid=grid,
            in_specs=[
                pl.BlockSpec((1, TB), lambda i: (0, i)),                 # x tile
                pl.BlockSpec((NHID, 1), const2),                         # w_in (resident)
                pl.BlockSpec((NHID, 1), const2),                         # b_in
                pl.BlockSpec((NLAYERS, NHID, NHID), const3),             # w_hid
                pl.BlockSpec((NLAYERS, NHID, 1), const3),                # b_hid
                pl.BlockSpec((FFT_CHANNELS, NHID), const2),              # w_out
                pl.BlockSpec((FFT_CHANNELS, 1), const2),                 # b_out
            ],
            out_specs=pl.BlockSpec((FFT_CHANNELS, TB), lambda i: (0, i)),
        ),
        compiler_params=pltpu.CompilerParams(
            dimension_semantics=("parallel",)),                          # v7x: 2 TCs
    )(xT, w_in, b_in, w_hid, b_hid, w_out, b_out)

    yT = yT[:, :B]
    if feature_major_output:
        return yT                       # (FFT, B): skips the extra HBM transpose pass
    return jnp.transpose(yT)            # torch layout (B, FFT)


# ---------------------------- parameter creation ------------------------------
def init_params(key):
    ks = jax.random.split(key, 6)
    scale = 0.1
    # torch (out_features, in_features) layout; matmul weights in bf16.
    w_in = scale * jax.random.normal(ks[0], (NHID, 1), jnp.float32)
    b_in = scale * jax.random.normal(ks[1], (NHID, 1), jnp.float32)
    w_hid = (scale * jax.random.normal(ks[2], (NLAYERS, NHID, NHID),
                                       jnp.float32)).astype(jnp.bfloat16)
    b_hid = scale * jax.random.normal(ks[3], (NLAYERS, NHID, 1), jnp.float32)
    w_out = (scale * jax.random.normal(ks[4], (FFT_CHANNELS, NHID),
                                       jnp.float32)).astype(jnp.bfloat16)
    b_out = scale * jax.random.normal(ks[5], (FFT_CHANNELS, 1), jnp.float32)
    return w_in, b_in, w_hid, b_hid, w_out, b_out


# ----------------------------- pure-JAX reference ------------------------------
def decoder_ref(x, params):
    """Batch-major reference mirroring the kernel's bf16/f32 precision."""
    w_in, b_in, w_hid, b_hid, w_out, b_out = params
    h = jnp.maximum(x * jnp.transpose(w_in) + jnp.transpose(b_in), 0.0)  # (B, NHID)
    h = h.astype(jnp.bfloat16)
    for l in range(NLAYERS):
        acc = jnp.dot(h, jnp.transpose(w_hid[l]),
                      preferred_element_type=jnp.float32)
        h = jnp.maximum(acc + jnp.transpose(b_hid[l]), 0.0).astype(jnp.bfloat16)
    y = jnp.dot(h, jnp.transpose(w_out), preferred_element_type=jnp.float32)
    return jnp.maximum(y + jnp.transpose(b_out), 0.0)


if __name__ == "__main__":
    key = jax.random.PRNGKey(0)
    k_x, k_p = jax.random.split(key)
    x = jax.random.normal(k_x, (BATCH, 1), jnp.float32)
    params = init_params(k_p)

    y_ref = decoder_ref(x, params)

    # Default path: large tile -> single grid step (even 2-way split on v7x).
    y = jax.block_until_ready(decoder_forward(x, params))
    assert y.shape == (BATCH, FFT_CHANNELS)
    assert jnp.allclose(y, y_ref, atol=1e-3, rtol=1e-3)

    # Multi-step grid + feature-major output (no wrapper transpose pass).
    yT = jax.block_until_ready(
        decoder_forward(x, params, block_b=128, num_cores=2,
                        feature_major_output=True))
    assert yT.shape == (FFT_CHANNELS, BATCH)
    assert jnp.allclose(jnp.transpose(yT), y_ref, atol=1e-3, rtol=1e-3)

    print("KERNEL_OK")
</pallas_src>

<mosaic_0001>
module attributes {stable_mosaic.version = 11 : i64} {
  func.func @decoder_kernel(%arg0: i32, %arg1: memref<1x384xf32, #tpu.memory_space<vmem>>, %arg2: memref<32x1xf32, #tpu.memory_space<vmem>>, %arg3: memref<32x1xf32, #tpu.memory_space<vmem>>, %arg4: memref<2x32x32xbf16, #tpu.memory_space<vmem>>, %arg5: memref<2x32x1xf32, #tpu.memory_space<vmem>>, %arg6: memref<16x32xbf16, #tpu.memory_space<vmem>>, %arg7: memref<16x1xf32, #tpu.memory_space<vmem>>, %arg8: memref<16x384xf32, #tpu.memory_space<vmem>>) attributes {dimension_semantics = [#tpu.dimension_semantics<parallel>], iteration_bounds = array<i64: 1>, scalar_prefetch = 0 : i64, scratch_operands = 0 : i64, tpu.core_type = #tpu.core_type<tc>, window_params = [{transform_indices = @transform_0, window_bounds = array<i64: 1, 384>}, {pipeline_mode = #tpu.pipeline_mode<synchronous>, transform_indices = @transform_1, window_bounds = array<i64: 32, 1>}, {pipeline_mode = #tpu.pipeline_mode<synchronous>, transform_indices = @transform_2, window_bounds = array<i64: 32, 1>}, {pipeline_mode = #tpu.pipeline_mode<synchronous>, transform_indices = @transform_3, window_bounds = array<i64: 2, 32, 32>}, {pipeline_mode = #tpu.pipeline_mode<synchronous>, transform_indices = @transform_4, window_bounds = array<i64: 2, 32, 1>}, {pipeline_mode = #tpu.pipeline_mode<synchronous>, transform_indices = @transform_5, window_bounds = array<i64: 16, 32>}, {pipeline_mode = #tpu.pipeline_mode<synchronous>, transform_indices = @transform_6, window_bounds = array<i64: 16, 1>}, {transform_indices = @transform_7, window_bounds = array<i64: 16, 384>}]} {
    %c0 = arith.constant 0 : index
    %c0_0 = arith.constant 0 : index
    %0 = vector.load %arg2[%c0, %c0_0] : memref<32x1xf32, #tpu.memory_space<vmem>>, vector<32x1xf32>
    %c0_1 = arith.constant 0 : index
    %c0_2 = arith.constant 0 : index
    %1 = vector.load %arg1[%c0_1, %c0_2] : memref<1x384xf32, #tpu.memory_space<vmem>>, vector<1x384xf32>
    %2 = vector.broadcast %0 : vector<32x1xf32> to vector<32x384xf32>
    %3 = vector.broadcast %1 : vector<1x384xf32> to vector<32x384xf32>
    %4 = arith.mulf %2, %3 : vector<32x384xf32>
    %c0_3 = arith.constant 0 : index
    %c0_4 = arith.constant 0 : index
    %5 = vector.load %arg3[%c0_3, %c0_4] : memref<32x1xf32, #tpu.memory_space<vmem>>, vector<32x1xf32>
    %6 = vector.broadcast %5 : vector<32x1xf32> to vector<32x384xf32>
    %7 = arith.addf %4, %6 : vector<32x384xf32>
    %cst = arith.constant 0.000000e+00 : f32
    %8 = vector.broadcast %cst : f32 to vector<32x384xf32>
    %9 = arith.maximumf %7, %8 : vector<32x384xf32>
    %10 = arith.truncf %9 : vector<32x384xf32> to vector<32x384xbf16>
    %c0_5 = arith.constant 0 : index
    %c0_6 = arith.constant 0 : index
    %c0_7 = arith.constant 0 : index
    %11 = vector.load %arg4[%c0_5, %c0_6, %c0_7] : memref<2x32x32xbf16, #tpu.memory_space<vmem>>, vector<1x32x32xbf16>
    %12 = vector.shape_cast %11 : vector<1x32x32xbf16> to vector<32x32xbf16>
    %cst_8 = arith.constant dense<0.000000e+00> : vector<32x384xf32>
    %13 = tpu.matmul %12, %10, %cst_8 {dimension_numbers = #tpu.dot_dimension_numbers<[1], [0], [0], [1], [0, 0, 1, 1], [], []>} : vector<32x32xbf16>, vector<32x384xbf16>, vector<32x384xf32> -> vector<32x384xf32>
    %c0_9 = arith.constant 0 : index
    %c0_10 = arith.constant 0 : index
    %c0_11 = arith.constant 0 : index
    %14 = vector.load %arg5[%c0_9, %c0_10, %c0_11] : memref<2x32x1xf32, #tpu.memory_space<vmem>>, vector<1x32x1xf32>
    %15 = vector.shape_cast %14 : vector<1x32x1xf32> to vector<32x1xf32>
    %16 = vector.broadcast %15 : vector<32x1xf32> to vector<32x384xf32>
    %17 = arith.addf %13, %16 : vector<32x384xf32>
    %cst_12 = arith.constant 0.000000e+00 : f32
    %18 = vector.broadcast %cst_12 : f32 to vector<32x384xf32>
    %19 = arith.maximumf %17, %18 : vector<32x384xf32>
    %20 = arith.truncf %19 : vector<32x384xf32> to vector<32x384xbf16>
    %c1 = arith.constant 1 : index
    %c0_13 = arith.constant 0 : index
    %c0_14 = arith.constant 0 : index
    %21 = vector.load %arg4[%c1, %c0_13, %c0_14] : memref<2x32x32xbf16, #tpu.memory_space<vmem>>, vector<1x32x32xbf16>
    %22 = vector.shape_cast %21 : vector<1x32x32xbf16> to vector<32x32xbf16>
    %cst_15 = arith.constant dense<0.000000e+00> : vector<32x384xf32>
    %23 = tpu.matmul %22, %20, %cst_15 {dimension_numbers = #tpu.dot_dimension_numbers<[1], [0], [0], [1], [0, 0, 1, 1], [], []>} : vector<32x32xbf16>, vector<32x384xbf16>, vector<32x384xf32> -> vector<32x384xf32>
    %c1_16 = arith.constant 1 : index
    %c0_17 = arith.constant 0 : index
    %c0_18 = arith.constant 0 : index
    %24 = vector.load %arg5[%c1_16, %c0_17, %c0_18] : memref<2x32x1xf32, #tpu.memory_space<vmem>>, vector<1x32x1xf32>
    %25 = vector.shape_cast %24 : vector<1x32x1xf32> to vector<32x1xf32>
    %26 = vector.broadcast %25 : vector<32x1xf32> to vector<32x384xf32>
    %27 = arith.addf %23, %26 : vector<32x384xf32>
    %cst_19 = arith.constant 0.000000e+00 : f32
    %28 = vector.broadcast %cst_19 : f32 to vector<32x384xf32>
    %29 = arith.maximumf %27, %28 : vector<32x384xf32>
    %30 = arith.truncf %29 : vector<32x384xf32> to vector<32x384xbf16>
    %c0_20 = arith.constant 0 : index
    %c0_21 = arith.constant 0 : index
    %31 = vector.load %arg6[%c0_20, %c0_21] : memref<16x32xbf16, #tpu.memory_space<vmem>>, vector<16x32xbf16>
    %cst_22 = arith.constant dense<0.000000e+00> : vector<16x384xf32>
    %32 = tpu.matmul %31, %30, %cst_22 {dimension_numbers = #tpu.dot_dimension_numbers<[1], [0], [0], [1], [0, 0, 1, 1], [], []>} : vector<16x32xbf16>, vector<32x384xbf16>, vector<16x384xf32> -> vector<16x384xf32>
    %c0_23 = arith.constant 0 : index
    %c0_24 = arith.constant 0 : index
    %33 = vector.load %arg7[%c0_23, %c0_24] : memref<16x1xf32, #tpu.memory_space<vmem>>, vector<16x1xf32>
    %34 = vector.broadcast %33 : vector<16x1xf32> to vector<16x384xf32>
    %35 = arith.addf %32, %34 : vector<16x384xf32>
    %cst_25 = arith.constant 0.000000e+00 : f32
    %36 = vector.broadcast %cst_25 : f32 to vector<16x384xf32>
    %37 = arith.maximumf %35, %36 : vector<16x384xf32>
    %c0_26 = arith.constant 0 : index
    %c0_27 = arith.constant 0 : index
    %38 = vector.load %arg8[%c0_26, %c0_27] : memref<16x384xf32, #tpu.memory_space<vmem>>, vector<16x384xf32>
    tpu.vector_store %arg8[%c0_26, %c0_27], %37 {strides = array<i32>} : memref<16x384xf32, #tpu.memory_space<vmem>>, vector<16x384xf32>,
    return
  }
  func.func @transform_0(%arg0: i32) -> (i32, i32) {
    %c0_i32 = arith.constant 0 : i32
    %c0_i32_0 = arith.constant 0 : i32
    return %c0_i32, %arg0 : i32, i32
  }
  func.func @transform_1(%arg0: i32) -> (i32, i32) {
    %c0_i32 = arith.constant 0 : i32
    %c0_i32_0 = arith.constant 0 : i32
    %c0_i32_1 = arith.constant 0 : i32
    return %c0_i32, %c0_i32_0 : i32, i32
  }
  func.func @transform_2(%arg0: i32) -> (i32, i32) {
    %c0_i32 = arith.constant 0 : i32
    %c0_i32_0 = arith.constant 0 : i32
    %c0_i32_1 = arith.constant 0 : i32
    return %c0_i32, %c0_i32_0 : i32, i32
  }
  func.func @transform_3(%arg0: i32) -> (i32, i32, i32) {
    %c0_i32 = arith.constant 0 : i32
    %c0_i32_0 = arith.constant 0 : i32
    %c0_i32_1 = arith.constant 0 : i32
    %c0_i32_2 = arith.constant 0 : i32
    return %c0_i32, %c0_i32_0, %c0_i32_1 : i32, i32, i32
  }
  func.func @transform_4(%arg0: i32) -> (i32, i32, i32) {
    %c0_i32 = arith.constant 0 : i32
    %c0_i32_0 = arith.constant 0 : i32
    %c0_i32_1 = arith.constant 0 : i32
    %c0_i32_2 = arith.constant 0 : i32
    return %c0_i32, %c0_i32_0, %c0_i32_1 : i32, i32, i32
  }
  func.func @transform_5(%arg0: i32) -> (i32, i32) {
    %c0_i32 = arith.constant 0 : i32
    %c0_i32_0 = arith.constant 0 : i32
    %c0_i32_1 = arith.constant 0 : i32
    return %c0_i32, %c0_i32_0 : i32, i32
  }
  func.func @transform_6(%arg0: i32) -> (i32, i32) {
    %c0_i32 = arith.constant 0 : i32
    %c0_i32_0 = arith.constant 0 : i32
    %c0_i32_1 = arith.constant 0 : i32
    return %c0_i32, %c0_i32_0 : i32, i32
  }
  func.func @transform_7(%arg0: i32) -> (i32, i32) {
    %c0_i32 = arith.constant 0 : i32
    %c0_i32_0 = arith.constant 0 : i32
    return %c0_i32, %arg0 : i32, i32
  }
}

</mosaic_0001>

<bundles_post_ra>
// kernel: tpu_custom_call.1
= control target key start
LH: loop header
LB: loop body
LE: loop exit
PB: predicated region body
PF: predicated region fallthrough
CT: control target
= control target key end

     0   :  { %v695_v2 = vmov 0   ;;  %s846_s0 = inlined_call_operand.vmem [shape: f32[1,384], index: 0, kind: input, shape index: {}]   ;;  %s847_s1 = inlined_call_operand.vmem [shape: f32[32,1], index: 1, kind: input, shape index: {}]   ;;  %s848_s2 = inlined_call_operand.vmem [shape: f32[32,1], index: 2, kind: input, shape index: {}]   ;;  %s849_s3 = inlined_call_operand.vmem [shape: bf16[2,32,32], index: 3, kind: input, shape index: {}]   ;;  %s850_s4 = inlined_call_operand.vmem [shape: f32[2,32,1], index: 4, kind: input, shape index: {}]   ;;  %s851_s5 = inlined_call_operand.vmem [shape: bf16[16,32], index: 5, kind: input, shape index: {}]   ;;  %s852_s6 = inlined_call_operand.vmem [shape: f32[16,1], index: 6, kind: input, shape index: {}]   ;;  %s853_s7 = inlined_call_operand.hbm [shape: f32[16,384], index: 7, kind: output, shape index: {}]  }
   0x1   :  { %v81_v0 = vld [vmem:[%s848_s2] sm:$0xff]  ;;  %665 = vset.pattern.permute.xlu1 %v695_v2  ;;  %664 = vset.pattern.permute.xlu0 %v695_v2  ;;  %v82_v3 = vld [vmem:[%s848_s2 + $0x8] sm:$0xff]  ;;  %v31_v5 = vld [vmem:[%s847_s1 + $0x18] sm:$0xff] }
   0x2   :  { %v28_v1 = vld [vmem:[%s847_s1] sm:$0xff]  ;;  %87 = vperm.xlu1 %665, %v81_v0   ;;  %v29_v4 = vld [vmem:[%s847_s1 + $0x8] sm:$0xff]  ;;  %212 = vmatprep.mubr.bf16.mxu0 %v695_v2  ;;  %v30_v6 = vld [vmem:[%s847_s1 + $0x10] sm:$0xff] }
   0x3   :  { %35 = vperm.xlu0 %664, %v28_v1  }
   0x6   :  { %92 = vperm.xlu1 %665, %v82_v3  }
   0x7   :  { %40 = vperm.xlu0 %664, %v29_v4  }
   0x8   :  { %12 = vsyncpa [#allocation3], 0  ;;  %v84_v7 = vld [vmem:[%s848_s2 + $0x18] sm:$0xff]  ;;  %v83_v8 = vld [vmem:[%s848_s2 + $0x10] sm:$0xff]  ;;  %vm173_vm0 = vcmask 261120   ;;  %v54_v20 = vlaneseq  ;;  %vm697_vm1 = vmmov 0  }
   0x9   :  { %v140_v9 = vld [vmem:[%s850_s4 + $0x8] sm:$0xff]  ;;  %v139_v10 = vld [vmem:[%s850_s4] sm:$0xff]  ;;  %v142_v11 = vld [vmem:[%s850_s4 + $0x18] sm:$0xff] }
   0xa   :  { %50 = vperm.xlu1 %665, %v31_v5   ;;  %v141_v12 = vld [vmem:[%s850_s4 + $0x10] sm:$0xff]  ;;  %v783_v13 = vld [vmem:[%s849_s3] sm:$0xff]   ;;  %v611_v14 = vld [vmem:[%s850_s4 + $0x28] sm:$0xff]  ;;  %v55_v21 = vshrl.u32 %v54_v20, 7 }
   0xb   :  { %45 = vperm.xlu0 %664, %v30_v6   ;;  %v610_v15 = vld [vmem:[%s850_s4 + $0x20] sm:$0xff]  ;;  %638 = vmatprep.mubr.msk.bf16.mxu1 %vm173_vm0, %v783_v13  ;;  %v613_v16 = vld [vmem:[%s850_s4 + $0x38] sm:$0xff]  ;;  %v612_v17 = vld [vmem:[%s850_s4 + $0x30] sm:$0xff] }
   0xc   :  { %v469_v18 = vld [vmem:[%s852_s6 + $0x8] sm:$0xff]  ;;  %v468_v19 = vld [vmem:[%s852_s6] sm:$0xff]  ;;  %v60_v22 = vsub.s32 1, %v55_v21  ;;  %v64_v23 = vsub.s32 2, %v55_v21  ;;  %v56_v25 = vsub.s32 0, %v55_v21 }
   0xd   :  { %v32_v24 = vld [vmem:[%s846_s0] sm:$0x7] }
   0xe   :  { %102 = vperm.xlu1 %665, %v84_v7   ;;  %v61_v26 = vrot.slane %v32_v24, %v60_v22  ;;  %v65_v27 = vrot.slane %v32_v24, %v64_v23  ;;  %v57_v28 = vrot.slane %v32_v24, %v56_v25 }
   0xf   :  { %97 = vperm.xlu0 %664, %v83_v8  }
  0x12   :  { %150 = vperm.xlu1 %665, %v140_v9  }
  0x13   :  { %145 = vperm.xlu0 %664, %v139_v10  }
  0x16   :  { %160 = vperm.xlu1 %665, %v142_v11  }
  0x17   :  { %155 = vperm.xlu0 %664, %v141_v12  }
  0x1a   :  { %317 = vperm.xlu1 %665, %v611_v14  }
  0x1b   :  { %312 = vperm.xlu0 %664, %v610_v15  }
  0x1e   :  { %327 = vperm.xlu1 %665, %v613_v16  }
  0x1f   :  { %322 = vperm.xlu0 %664, %v612_v17   ;;  %v667_v17 = vld [vmem:[%s849_s3 + $0x8] sm:$0xff]  }
  0x22   :  { %477 = vperm.xlu1 %665, %v469_v18   ;;  %v668_v18 = vld [vmem:[%s849_s3 + $0x10] sm:$0xff]  }
  0x23   :  { %472 = vperm.xlu0 %664, %v468_v19  }
  0x81   :  { %v88_v29 = vpop.permute.xlu1 %87 }
  0x82   :  { %v36_v30 = vpop.permute.xlu0 %35 }
  0x83   :  { %v70_v31 = vmul.f32 %v61_v26, %v36_v30  ;;  %v71_v32 = vmul.f32 %v65_v27, %v36_v30  ;;  %v69_v33 = vmul.f32 %v57_v28, %v36_v30 }
  0x85   :  { %v93_v34 = vpop.permute.xlu1 %92  ;;  %v106_v36 = vadd.f32 %v88_v29, %v70_v31  ;;  %v107_v40 = vadd.f32 %v88_v29, %v71_v32  ;;  %v105_v41 = vadd.f32 %v88_v29, %v69_v33 }
  0x86   :  { %v41_v35 = vpop.permute.xlu0 %40 }
  0x87   :  { %v72_v37 = vmul.f32 %v57_v28, %v41_v35  ;;  %v73_v38 = vmul.f32 %v61_v26, %v41_v35  ;;  %v74_v39 = vmul.f32 %v65_v27, %v41_v35  ;;  %v118_v47 = vmax.f32 %v106_v36, 0.0 }
  0x88   :  { %v119_v48 = vmax.f32 %v107_v40, 0.0  ;;  %v117_v52 = vmax.f32 %v105_v41, 0.0 }
  0x89   :  { %v109_v42 = vadd.f32 %v93_v34, %v73_v38  ;;  %v110_v43 = vadd.f32 %v93_v34, %v74_v39  ;;  %v108_v44 = vadd.f32 %v93_v34, %v72_v37  ;;  %v51_v45 = vpop.permute.xlu1 %50 }
  0x8a   :  { %v46_v46 = vpop.permute.xlu0 %45  ;;  %v78_v49 = vmul.f32 %v57_v28, %v51_v45  ;;  %v79_v53 = vmul.f32 %v61_v26, %v51_v45  ;;  %v80_v54 = vmul.f32 %v65_v27, %v51_v45 }
  0x8b   :  { %v121_v50 = vmax.f32 %v109_v42, 0.0  ;;  %v122_v51 = vmax.f32 %v110_v43, 0.0  ;;  %v75_v55 = vmul.f32 %v57_v28, %v46_v46  ;;  %v120_v56 = vmax.f32 %v108_v44, 0.0 }
  0x8c   :  { %v76_v57 = vmul.f32 %v61_v26, %v46_v46  ;;  %v77_v58 = vmul.f32 %v65_v27, %v46_v46 }
  0x8d   :  { %v103_v59 = vpop.permute.xlu1 %102  ;;  %v130_v61 = vpack.c.bf16 %v121_v50, %v118_v47  ;;  %v131_v62 = vpack.c.bf16 %v122_v51, %v119_v48  ;;  %v129_v6 = vpack.c.bf16 %v120_v56, %v117_v52 }
  0x8e   :  { %v98_v60 = vpop.permute.xlu0 %97  ;;  %v114_v63 = vadd.f32 %v103_v59, %v78_v49  ;;  %v115_v0 = vadd.f32 %v103_v59, %v79_v53  ;;  %v116_v1 = vadd.f32 %v103_v59, %v80_v54 }
  0x8f   :  { %v111_v3 = vadd.f32 %v98_v60, %v75_v55  ;;  %v112_v4 = vadd.f32 %v98_v60, %v76_v57  ;;  %v113_v5 = vadd.f32 %v98_v60, %v77_v58  ;;  %180 = vmatprep.subr.bf16.mxu0 %v130_v61  ;;  %634 = vmatprep.subr.bf16.mxu1 %v131_v62 }
  0x90   :  { %v126_v7 = vmax.f32 %v114_v63, 0.0  ;;  %v127_v8 = vmax.f32 %v115_v0, 0.0  ;;  %v128_v9 = vmax.f32 %v116_v1, 0.0  ;;  %635 = vmatpush3.bf16.msra.mxu1 %v131_v62  ;;  %181 = vmatpush1.bf16.msra.mxu0 %v129_v6  ;;  %v669_v62 = vld [vmem:[%s849_s3 + $0x18] sm:$0xff]   ;;  %v696_v1 = vmov 0.0  }
  0x91   :  { %v123_v10 = vmax.f32 %v111_v3, 0.0  ;;  %v124_v11 = vmax.f32 %v112_v4, 0.0  ;;  %v125_v12 = vmax.f32 %v113_v5, 0.0  ;;  %v151_v19 = vpop.permute.xlu1 %150 }
  0x92   :  { %v146_v20 = vpop.permute.xlu0 %145 }
  0x93   :  { %v132_v14 = vpack.c.bf16 %v126_v7, %v123_v10  ;;  %v133_v15 = vpack.c.bf16 %v127_v8, %v124_v11  ;;  %v134_v16 = vpack.c.bf16 %v128_v9, %v125_v12 }
  0x95   :  { %182 = vmatprep.subr.bf16.mxu0 %v133_v15  ;;  %636 = vmatprep.subr.bf16.mxu1 %v134_v16  ;;  %v161_v21 = vpop.permute.xlu1 %160 }
  0x96   :  { %183 = vmatpush1.bf16.msra.mxu0 %v132_v14  ;;  %637 = vmatpush3.bf16.msra.mxu1 %v134_v16  ;;  %v156_v22 = vpop.permute.xlu0 %155 }
  0x99   :  { %602 = vmatmul.mubr.msk.bf16.vlgmr.msra.gmra.mrb[0].mxu0 %vm173_vm0, %v783_v13  ;;  %639 = vmatmul.mubr.msk.bf16.vlgmr.msra.gmra.mrb[0].mxu1 %vm173_vm0, %v667_v17  ;;  %v318_v4 = vpop.permute.xlu1 %317 }
  0x9a   :  { %222 = vmatprep.mubr.bf16.mxu0 %v695_v2  ;;  %378 = vmatprep.mubr.bf16.mxu1 %v695_v2  ;;  %v313_v3 = vpop.permute.xlu0 %312 }
  0x9d   :  { %v328_v9 = vpop.permute.xlu1 %327 }
  0x9e   :  { %v323_v5 = vpop.permute.xlu0 %322 }
  0xa1   :  { %603 = vmatmul.mubr.msk.bf16.gmra.mrb[4].mxu0 %vm173_vm0, %v667_v17 }
  0xa2   :  { %646 = vmatprep.mubr.msk.bf16.mxu0 %vm173_vm0, %v668_v18 }
 0x16c   :  { %v214_v23 = vpop.f32.mrb[0].mxu0  ;;  %v640_v13 = vpop.f32.mrb[0].mxu1 }
 0x16d   :  { %v215_v24 = vadd.f32 %v214_v23, %v146_v20  ;;  %v276_v25 = vadd.f32 %v640_v13, %v156_v22  ;;  %v216_v26 = vpop.f32.mrb[1].mxu0  ;;  %v267_v27 = vpop.f32.mrb[1].mxu1 }
 0x16e   :  { %v217_v28 = vadd.f32 %v216_v26, %v146_v20  ;;  %v268_v29 = vadd.f32 %v267_v27, %v146_v20  ;;  %v218_v30 = vpop.f32.mrb[2].mxu0  ;;  %v641_v31 = vpop.f32.mrb[2].mxu1 }
 0x16f   :  { %v219_v32 = vadd.f32 %v218_v30, %v151_v19  ;;  %v279_v33 = vadd.f32 %v641_v31, %v161_v21  ;;  %v220_v34 = vpop.f32.mrb[3].mxu0  ;;  %v270_v35 = vpop.f32.mrb[3].mxu1  ;;  %v282_v38 = vmax.f32 %v215_v24, 0.0  ;;  %v290_v39 = vmax.f32 %v276_v25, 0.0 }
 0x170   :  { %v221_v36 = vadd.f32 %v220_v34, %v151_v19  ;;  %v271_v37 = vadd.f32 %v270_v35, %v151_v19  ;;  %v283_v42 = vmax.f32 %v217_v28, 0.0  ;;  %v284_v43 = vmax.f32 %v268_v29, 0.0 }
 0x171   :  { %v285_v40 = vmax.f32 %v219_v32, 0.0  ;;  %v293_v41 = vmax.f32 %v279_v33, 0.0 }
 0x172   :  { %v286_v44 = vmax.f32 %v221_v36, 0.0  ;;  %v287_v45 = vmax.f32 %v271_v37, 0.0  ;;  %v670_v37 = vld [vmem:[%s851_s5] sm:$0xff]   ;;  %s698_s5 = smov [#allocation2]  }
 0x173   :  { %v294_v46 = vpack.c.bf16 %v285_v40, %v282_v38  ;;  %v299_v47 = vpack.c.bf16 %v293_v41, %v290_v39  ;;  %s589_s20 = sshll.u32 %s698_s5, 4  ;;  %s590_s20 = int_to_ptr.vmem [resolvable:$true] %s589_s20 }
 0x174   :  { %v295_v48 = vpack.c.bf16 %v286_v44, %v283_v42  ;;  %v296_v49 = vpack.c.bf16 %v287_v45, %v284_v43  ;;  %v224_v50 = vpop.f32.mrb[4].mxu0  ;;  %s671_s1 = scalar_lea.vmem %s590_s20, 768  ;;  %p676_p1 = scmp.lt.s32.totalorder %s590_s20, %s590_s20 }
 0x175   :  { %v225_v51 = vadd.f32 %v224_v50, %v156_v22  ;;  %v226_v52 = vpop.f32.mrb[5].mxu0  ;;  %p672_p0 = scmp.ne.s32.totalorder %s590_s20, %s671_s1  ;;  %p677_p2 = scmp.lt.s32.totalorder %s671_s1, %s671_s1 }
 0x176   :  { %v227_v53 = vadd.f32 %v226_v52, %v156_v22  ;;  %v228_v54 = vpop.f32.mrb[6].mxu0  ;;  %346 = vmatprep.subr.bf16.mxu1 %v295_v48  ;;  %642 = vmatprep.subr.bf16.mxu0 %v296_v49 }
 0x177   :  { %v229_v55 = vadd.f32 %v228_v54, %v161_v21  ;;  %v230_v56 = vpop.f32.mrb[7].mxu0  ;;  %347 = vmatpush1.bf16.msra.mxu1 %v294_v46  ;;  %643 = vmatpush3.bf16.msra.mxu0 %v296_v49  ;;  %v288_v58 = vmax.f32 %v225_v51, 0.0  ;;  %v473_v49 = vpop.permute.xlu0 %472  ;;  %p678_p3 = por %p677_p2, %p676_p1 }
 0x178   :  { %v231_v57 = vadd.f32 %v230_v56, %v161_v21  ;;  %644 = vmatprep.subr.bf16.mxu0 %v299_v47  ;;  %v289_v60 = vmax.f32 %v227_v53, 0.0  ;;  %v478_v53 = vpop.permute.xlu1 %477 }
 0x179   :  { %v291_v59 = vmax.f32 %v229_v55, 0.0  ;;  %p679_p4 = pnand %p678_p3, %p672_p0 }
 0x17a   :  { %v292_v61 = vmax.f32 %v231_v57, 0.0 }
 0x17b   :  { %v297_v63 = vpack.c.bf16 %v291_v59, %v288_v58  ;;  %645 = vmatpush3.bf16.msra.mxu0 %v299_v47 }
 0x17c   :  { %v298_v0 = vpack.c.bf16 %v292_v61, %v289_v60 }
 0x17e   :  { %348 = vmatprep.subr.bf16.mxu1 %v298_v0  ;;  %647 = vmatmul.mubr.msk.bf16.vlgmr.msra.gmra.mrb[8].mxu0 %vm173_vm0, %v669_v62 }
 0x17f   :  { %349 = vmatpush1.bf16.msra.mxu1 %v297_v63  ;;  %520 = vmatprep.mubr.bf16.mxu0 %v695_v2 }
 0x180   :  { %650 = vmatprep.subr.bf16.mxu1 %v696_v1 }
 0x182   :  { %616 = vmatmul.mubr.msk.bf16.vlgmr.msra.gmra.mrb[4].mxu1 %vm173_vm0, %v668_v18 }
 0x183   :  { %388 = vmatprep.mubr.bf16.mxu1 %v695_v2 }
 0x18a   :  { %617 = vmatmul.mubr.msk.bf16.gmra.mrb[8].mxu1 %vm173_vm0, %v669_v62 }
 0x18b   :  { %654 = vmatprep.mubr.msk.bf16.mxu1 %vm697_vm1, %v696_v1 }
 0x251   :  { %v648_v6 = vpop.f32.mrb[8].mxu0 }
 0x252   :  { %v442_v7 = vadd.f32 %v648_v6, %v323_v5  ;;  %v433_v8 = vpop.f32.mrb[9].mxu0 }
 0x253   :  { %v434_v10 = vadd.f32 %v433_v8, %v313_v3  ;;  %v649_v11 = vpop.f32.mrb[10].mxu0 }
 0x254   :  { %v445_v12 = vadd.f32 %v649_v11, %v328_v9  ;;  %v436_v14 = vpop.f32.mrb[11].mxu0  ;;  %v456_v2 = vmax.f32 %v442_v7, 0.0 }
 0x255   :  { %v437_v15 = vadd.f32 %v436_v14, %v318_v4  ;;  %v380_v16 = vpop.f32.mrb[4].mxu1  ;;  %v450_v20 = vmax.f32 %v434_v10, 0.0 }
 0x256   :  { %v459_v17 = vmax.f32 %v445_v12, 0.0  ;;  %v381_v18 = vadd.f32 %v380_v16, %v313_v3  ;;  %v382_v19 = vpop.f32.mrb[5].mxu1 }
 0x257   :  { %v453_v21 = vmax.f32 %v437_v15, 0.0  ;;  %v383_v22 = vadd.f32 %v382_v19, %v313_v3  ;;  %v384_v23 = vpop.f32.mrb[6].mxu1 }
 0x258   :  { %v465_v13 = vpack.c.bf16 %v459_v17, %v456_v2  ;;  %v385_v24 = vadd.f32 %v384_v23, %v318_v4  ;;  %v386_v25 = vpop.f32.mrb[7].mxu1  ;;  %v448_v28 = vmax.f32 %v381_v18, 0.0 }
 0x259   :  { %v462_v26 = vpack.c.bf16 %v453_v21, %v450_v20  ;;  %v387_v27 = vadd.f32 %v386_v25, %v318_v4  ;;  %v449_v30 = vmax.f32 %v383_v22, 0.0 }
 0x25a   :  { %v451_v29 = vmax.f32 %v385_v24, 0.0 }
 0x25b   :  { %v452_v31 = vmax.f32 %v387_v27, 0.0  ;;  %651 = vmatpush3.bf16.msra.mxu1 %v462_v26 }
 0x25c   :  { %v460_v32 = vpack.c.bf16 %v451_v29, %v448_v28  ;;  %652 = vmatprep.subr.bf16.mxu1 %v696_v1 }
 0x25d   :  { %v461_v33 = vpack.c.bf16 %v452_v31, %v449_v30  ;;  %v390_v34 = vpop.f32.mrb[8].mxu1 }
 0x25e   :  { %v391_v35 = vadd.f32 %v390_v34, %v323_v5  ;;  %v392_v36 = vpop.f32.mrb[9].mxu1 }
 0x25f   :  { %v393_v38 = vadd.f32 %v392_v36, %v323_v5  ;;  %v394_v39 = vpop.f32.mrb[10].mxu1  ;;  %488 = vmatprep.subr.bf16.mxu0 %v461_v33  ;;  %653 = vmatpush3.bf16.msra.mxu1 %v465_v13 }
 0x260   :  { %v395_v40 = vadd.f32 %v394_v39, %v328_v9  ;;  %v396_v41 = vpop.f32.mrb[11].mxu1  ;;  %489 = vmatpush1.bf16.msra.mxu0 %v460_v32  ;;  %v454_v43 = vmax.f32 %v391_v35, 0.0 }
 0x261   :  { %v397_v42 = vadd.f32 %v396_v41, %v328_v9  ;;  %v455_v45 = vmax.f32 %v393_v38, 0.0 }
 0x262   :  { %v457_v44 = vmax.f32 %v395_v40, 0.0  ;;  %655 = vmatmul.mubr.msk.bf16.vlgmr.msra.gmra.mrb[12].mxu1 %vm173_vm0, %v670_v37 }
 0x263   :  { %v458_v46 = vmax.f32 %v397_v42, 0.0 }
 0x264   :  { %v463_v47 = vpack.c.bf16 %v457_v44, %v454_v43 }
 0x265   :  { %v464_v48 = vpack.c.bf16 %v458_v46, %v455_v45 }
 0x267   :  { %490 = vmatprep.subr.bf16.mxu0 %v464_v48 }
 0x268   :  { %491 = vmatpush1.bf16.msra.mxu0 %v463_v47 }
 0x26b   :  { %621 = vmatmul.mubr.msk.bf16.vlgmr.msra.gmra.mrb[12].mxu0 %vm173_vm0, %v670_v37 }
 0x335   :  { %v565_v50 = vpop.f32.mrb[12].mxu1 }
 0x336   :  { %v566_v51 = vadd.f32 %v565_v50, %v473_v49  ;;  %v656_v52 = vpop.f32.mrb[13].mxu1 }
 0x337   :  { %v568_v54 = vpop.f32.mrb[14].mxu1 }
 0x338   :  { %v574_v55 = vmax.f32 %v566_v51, 0.0  ;;  %v569_v56 = vadd.f32 %v568_v54, %v478_v53  ;;  %v657_v57 = vpop.f32.mrb[15].mxu1 }
 0x33a   :  { %580 = vst [vmem:[#allocation2 + $0x10] sm:$0xff] %v574_v55  ;;  %v577_v58 = vmax.f32 %v569_v56, 0.0 }
 0x33c   :  { %583 = vst [vmem:[#allocation2 + $0x28] sm:$0xff] %v577_v58 }
 0x33e   :  { %v522_v59 = vpop.f32.mrb[12].mxu0 }
 0x33f   :  { %v523_v60 = vadd.f32 %v522_v59, %v473_v49  ;;  %v524_v61 = vpop.f32.mrb[13].mxu0 }
 0x340   :  { %v525_v62 = vadd.f32 %v524_v61, %v473_v49  ;;  %v526_v63 = vpop.f32.mrb[14].mxu0 }
 0x341   :  { %v572_v0 = vmax.f32 %v523_v60, 0.0  ;;  %v527_v1 = vadd.f32 %v526_v63, %v478_v53  ;;  %v528_v3 = vpop.f32.mrb[15].mxu0 }
 0x342   :  { %v573_v4 = vmax.f32 %v525_v62, 0.0  ;;  %v529_v5 = vadd.f32 %v528_v3, %v478_v53 }
 0x343   :  { %578 = vst [vmem:[#allocation2] sm:$0xff] %v572_v0  ;;  %v575_v6 = vmax.f32 %v527_v1, 0.0 }
 0x344   :  { %579 = vst [vmem:[#allocation2 + $0x8] sm:$0xff] %v573_v4  ;;  %v576_v7 = vmax.f32 %v529_v5, 0.0 }
 0x345   :  { %581 = vst [vmem:[#allocation2 + $0x18] sm:$0xff] %v575_v6 }
 0x346   :  { %582 = vst [vmem:[#allocation2 + $0x20] sm:$0xff] %v576_v7 }
 0x347   :  { %682 = shalt.err (!%p679_p4)
}
 0x348   :  { %s683_s23 = scalar_lea.hbm %s853_s7, 768 }
 0x349   :  { %p684_p5 = scmp.ne.s32.totalorder %s853_s7, %s683_s23  ;;  %p687_p6 = scmp.lt.u32.totalorder %s683_s23, %s853_s7 }
 0x34b   :  { %p689_p7 = pnand %p687_p6, %p684_p5 }
 0x34d   :  { %692 = shalt.err (!%p689_p7)
}
 0x34e   :  { %s699_s27 = smov 384   ;;  %s700_s28 = smov 24  }
 0x34f   :  { %595 = dma.vmem_to_hbm [thread:$0]  %s590_s20, 768, %s853_s7, [#allocation3], %s699_s27, %s699_s27, %s700_s28  }
 0x350   :  { %693 = dma.done.wait [#allocation3], 768  }
 0x351   :  { %694 = vsyncadd [#allocation3], 4294966528 }
 0x352   :  { %599 = vsyncpa [#allocation3], 1 }

</bundles_post_ra>
